<compile_context>
chip_gen: v7x
topology: tpu7x:2x2x1
jax: 0.10.0
libtpu: 0.0.40
codegen_flags: <defaults>
</compile_context>

<pallas_src>
import functools

import jax
import jax.numpy as jnp
from jax.experimental import pallas as pl
from jax.experimental.pallas import tpu as pltpu

LN_EPS = 1e-5  # PyTorch nn.LayerNorm default


# ----------------------------------------------------------------------------- kernel
def mlp_critic_kernel(x_ref, w1_ref, b1_ref, g_ref, beta_ref,
                      w2_ref, b2_ref, w3_ref, b3_ref,
                      v_ref, h_ref, *, hid_true):
    cd = w1_ref.dtype                      # MXU operand dtype (bf16 by default)
    f32 = jnp.float32
    hp = w1_ref.shape[1]                   # lane-padded hidden size (multiple of 128)

    # fc1 (MXU, f32 accumulation).  x is cast in-kernel, not in the wrapper.
    x = x_ref[...].astype(cd)
    z1 = jnp.dot(x, w1_ref[...], preferred_element_type=f32) + b1_ref[...]

    # LayerNorm over the TRUE hidden width.  Pad lanes of z1 are exactly 0 (padded w1
    # columns / b1 entries are zero), but (z1 - mu) is -mu there, so they must be masked
    # out of the variance.
    inv_h = 1.0 / hid_true
    mu = jnp.sum(z1, axis=-1, keepdims=True) * inv_h
    d = z1 - mu
    if hp != hid_true:
        lane = jax.lax.broadcasted_iota(jnp.int32, (1, hp), 1)
        d = d * (lane < hid_true).astype(f32)
    var = jnp.sum(d * d, axis=-1, keepdims=True) * inv_h
    z1n = d * jax.lax.rsqrt(var + LN_EPS) * g_ref[...] + beta_ref[...]

    # ReLU, then back to bf16 for the next MXU pass.
    a1 = jnp.maximum(z1n, 0.0).astype(cd)

    # fc2 + ReLU  (padded rows/cols of w2 are zero, so pad lanes of h stay exactly 0).
    z2 = jnp.dot(a1, w2_ref[...], preferred_element_type=f32) + b2_ref[...]
    h = jnp.maximum(z2, 0.0)

    # fc3  (padded rows of w3 are zero).
    v = jnp.dot(h.astype(cd), w3_ref[...], preferred_element_type=f32) + b3_ref[...]

    v_ref[...] = v.astype(v_ref.dtype)
    h_ref[...] = h[:, :hid_true].astype(h_ref.dtype)


# ----------------------------------------------------------------------------- helpers
def _round_up(n, m):
    return ((n + m - 1) // m) * m


def _invariant_spec(shape):
    """Grid-invariant operand: fetched once; single-buffered so the pipeline does not
    reserve a pointless double buffer for it."""
    index_map = lambda i: (0, 0)
    try:
        return pl.BlockSpec(shape, index_map, pipeline_mode=pl.Buffered(1))
    except Exception:  # older jax without pipeline_mode / Buffered
        return pl.BlockSpec(shape, index_map)


def _tpu_vmem_capacity():
    try:
        return int(pltpu.get_tpu_info().vmem_capacity_bytes)
    except Exception:
        return 64 * 1024 * 1024  # conservative: v7x per-TensorCore VMEM


def _plan(B, D, Hp, H, O, x_bytes, cd_bytes, h_bytes, v_bytes, tile_b=None):
    """Pick the batch tile and a VMEM limit from the actual per-generation capacity."""
    cap = _tpu_vmem_capacity()
    budget = max(8 << 20, int(0.75 * cap))   # leave headroom for Mosaic internal scratch
    two_cores = cap <= (80 << 20)            # v7x-like: 64 MiB/TensorCore, 2 TCs/chip

    # weights / biases / LN params (single-buffered thanks to pl.Buffered(1))
    weights = (D * Hp + Hp * Hp + Hp * O) * cd_bytes + (4 * Hp + O) * 4

    def footprint(tb):
        act = 2 * tb * (D * x_bytes + H * h_bytes + O * v_bytes)  # double-buffered tiles
        tmp = tb * (4 * Hp + O) * 4                               # f32 body temporaries
        return weights + act + tmp

    if tile_b is None:
        tile_cap = 1024 if two_cores else 2048      # bigger tiles on 128 MiB parts
        tb = min(B, tile_cap)
        if B > 8:
            tb = max(8, (tb // 8) * 8)
        while tb > 8 and footprint(tb) > budget:
            tb = max(8, ((tb // 2) // 8) * 8)
        if two_cores and B > 16:
            # Keep an even number of grid steps so both TensorCores get equal work.
            steps = pl.cdiv(B, tb)
            if steps % 2:
                steps += 1
            tb = min(tb, max(8, _round_up(pl.cdiv(B, steps), 8)))
    else:
        tb = min(tile_b, B)

    vmem_limit = max(16 << 20, min(budget, int(1.25 * footprint(tb)) + (2 << 20)))
    return tb, vmem_limit


# ----------------------------------------------------------------------------- param prep (one-time)
def prepare_params(params, compute_dtype=jnp.bfloat16):
    """One-time cast/pad of the parameters.  Call once and reuse across forward calls so
    the per-step path never re-casts or re-pads the weights."""
    cd = jnp.dtype(compute_dtype)
    H = params["w1"].shape[1]
    Hp = _round_up(H, 128)

    pc = lambda a: a if a.shape[1] == Hp else jnp.pad(a, ((0, 0), (0, Hp - a.shape[1])))
    pr = lambda a: a if a.shape[0] == Hp else jnp.pad(a, ((0, Hp - a.shape[0]), (0, 0)))

    return {
        "w1": pc(params["w1"]).astype(cd),               # (D, Hp)
        "b1": pc(params["b1"]).astype(jnp.float32),      # (1, Hp)
        "ln_g": pc(params["ln_g"]).astype(jnp.float32),  # (1, Hp)
        "ln_b": pc(params["ln_b"]).astype(jnp.float32),  # (1, Hp)
        "w2": pr(pc(params["w2"])).astype(cd),           # (Hp, Hp)
        "b2": pc(params["b2"]).astype(jnp.float32),      # (1, Hp)
        "w3": pr(params["w3"]).astype(cd),               # (Hp, O)
        "b3": params["b3"].astype(jnp.float32),          # (1, O)
    }


# ----------------------------------------------------------------------------- wrapper
@functools.partial(jax.jit, static_argnames=("hid_size", "tile_b", "h_dtype", "v_dtype"))
def mlp_critic_forward(x, prepped, *, hid_size, tile_b=None,
                       h_dtype=jnp.bfloat16, v_dtype=jnp.float32):
    B, D = x.shape
    Hp = prepped["w1"].shape[1]
    O = prepped["w3"].shape[1]
    cd = jnp.dtype(prepped["w1"].dtype)
    hd = jnp.dtype(h_dtype)
    vd = jnp.dtype(v_dtype)

    tb, vmem_limit = _plan(B, D, Hp, hid_size, O,
                           jnp.dtype(x.dtype).itemsize, cd.itemsize,
                           hd.itemsize, vd.itemsize, tile_b)
    grid = (pl.cdiv(B, tb),)
    row = lambda i: (i, 0)

    v, h = pl.pallas_call(
        functools.partial(mlp_critic_kernel, hid_true=hid_size),
        out_shape=(jax.ShapeDtypeStruct((B, O), vd),
                   jax.ShapeDtypeStruct((B, hid_size), hd)),
        grid_spec=pl.GridSpec(
            grid=grid,
            in_specs=[
                pl.BlockSpec((tb, D), row),      # x (cast to bf16 inside the kernel)
                _invariant_spec((D, Hp)),        # w1
                _invariant_spec((1, Hp)),        # b1
                _invariant_spec((1, Hp)),        # ln gamma
                _invariant_spec((1, Hp)),        # ln beta
                _invariant_spec((Hp, Hp)),       # w2
                _invariant_spec((1, Hp)),        # b2
                _invariant_spec((Hp, O)),        # w3
                _invariant_spec((1, O)),         # b3
            ],
            out_specs=[
                pl.BlockSpec((tb, O), row),          # v
                pl.BlockSpec((tb, hid_size), row),   # h
            ],
        ),
        compiler_params=pltpu.CompilerParams(
            dimension_semantics=("parallel",),
            vmem_limit_bytes=vmem_limit,
        ),
    )(x, prepped["w1"], prepped["b1"], prepped["ln_g"], prepped["ln_b"],
      prepped["w2"], prepped["b2"], prepped["w3"], prepped["b3"])

    return v, h


# ----------------------------------------------------------------------------- params / reference
def init_params(key, input_shape, hid_size, output_shape, dtype=jnp.float32):
    """Deterministic PyTorch-like uniform(-1/sqrt(fan_in), 1/sqrt(fan_in)) init."""
    ks = jax.random.split(key, 6)

    def lin(kw, kb, fan_in, fan_out):
        bound = 1.0 / jnp.sqrt(fan_in)
        w = jax.random.uniform(kw, (fan_in, fan_out), dtype, -bound, bound)
        b = jax.random.uniform(kb, (1, fan_out), dtype, -bound, bound)
        return w, b

    w1, b1 = lin(ks[0], ks[1], input_shape, hid_size)
    w2, b2 = lin(ks[2], ks[3], hid_size, hid_size)
    w3, b3 = lin(ks[4], ks[5], hid_size, output_shape)
    return {
        "w1": w1, "b1": b1,
        "ln_g": jnp.ones((1, hid_size), dtype),
        "ln_b": jnp.zeros((1, hid_size), dtype),
        "w2": w2, "b2": b2,
        "w3": w3, "b3": b3,
    }


def reference_forward(x, p, compute_dtype=jnp.float32):
    """Pure-JAX reference; compute_dtype=bf16 mirrors the kernel's MXU quantization."""
    cd = compute_dtype
    f32 = jnp.float32
    z1 = jnp.dot(x.astype(cd), p["w1"].astype(cd),
                 preferred_element_type=f32) + p["b1"]
    mu = jnp.mean(z1, axis=-1, keepdims=True)
    d = z1 - mu
    var = jnp.mean(d * d, axis=-1, keepdims=True)
    z1 = d / jnp.sqrt(var + LN_EPS) * p["ln_g"] + p["ln_b"]
    a1 = jnp.maximum(z1, 0.0).astype(cd)
    h = jnp.maximum(jnp.dot(a1, p["w2"].astype(cd),
                            preferred_element_type=f32) + p["b2"], 0.0)
    v = jnp.dot(h.astype(cd), p["w3"].astype(cd),
                preferred_element_type=f32) + p["b3"]
    return v, h


# TODO(synk): date_emb=True path (nn.Embedding month/weekday lookups + concat) is pure
# gather glue that lives outside the kernel; not implemented here.

if __name__ == "__main__":
    key = jax.random.PRNGKey(0)
    B, INPUT_SHAPE, HID_SIZE, OUTPUT_SHAPE = 8, 32, 32, 1

    kx, kp = jax.random.split(key)
    x = jax.random.normal(kx, (B, INPUT_SHAPE), jnp.float32)
    params = init_params(kp, INPUT_SHAPE, HID_SIZE, OUTPUT_SHAPE)

    # One-time weight cast / pad (outside the per-step path).
    prepped = prepare_params(params)

    v, h = mlp_critic_forward(x, prepped, hid_size=HID_SIZE)
    jax.block_until_ready((v, h))

    assert v.shape == (B, OUTPUT_SHAPE) and h.shape == (B, HID_SIZE)

    # Tight check against a reference that uses the same bf16-operand / f32-accumulate math
    # (kernel h is bf16 on the way out; well inside these tolerances).
    v_bf, h_bf = reference_forward(x, params, compute_dtype=jnp.bfloat16)
    assert jnp.allclose(v, v_bf, atol=1e-2, rtol=1e-2), float(jnp.max(jnp.abs(v - v_bf)))
    assert jnp.allclose(h.astype(jnp.float32), h_bf, atol=1e-2, rtol=1e-2), \
        float(jnp.max(jnp.abs(h.astype(jnp.float32) - h_bf)))

    # Loose sanity check against the full-f32 module semantics.
    v32, h32 = reference_forward(x, params, compute_dtype=jnp.float32)
    assert jnp.allclose(v, v32, atol=1e-1, rtol=1e-1)
    assert jnp.allclose(h.astype(jnp.float32), h32, atol=1e-1, rtol=1e-1)

    print("KERNEL_OK")
</pallas_src>

<mosaic_0001>
module attributes {stable_mosaic.version = 11 : i64} {
  func.func @mlp_critic_kernel(%arg0: i32, %arg1: memref<8x32xf32, #tpu.memory_space<vmem>>, %arg2: memref<32x128xbf16, #tpu.memory_space<vmem>>, %arg3: memref<1x128xf32, #tpu.memory_space<vmem>>, %arg4: memref<1x128xf32, #tpu.memory_space<vmem>>, %arg5: memref<1x128xf32, #tpu.memory_space<vmem>>, %arg6: memref<128x128xbf16, #tpu.memory_space<vmem>>, %arg7: memref<1x128xf32, #tpu.memory_space<vmem>>, %arg8: memref<128x1xbf16, #tpu.memory_space<vmem>>, %arg9: memref<1x1xf32, #tpu.memory_space<vmem>>, %arg10: memref<8x1xf32, #tpu.memory_space<vmem>>, %arg11: memref<8x32xbf16, #tpu.memory_space<vmem>>) attributes {dimension_semantics = [#tpu.dimension_semantics<parallel>], iteration_bounds = array<i64: 1>, scalar_prefetch = 0 : i64, scratch_operands = 0 : i64, tpu.core_type = #tpu.core_type<tc>, window_params = [{transform_indices = @transform_0, window_bounds = array<i64: 8, 32>}, {pipeline_mode = #tpu.pipeline_mode<synchronous>, transform_indices = @transform_1, window_bounds = array<i64: 32, 128>}, {pipeline_mode = #tpu.pipeline_mode<synchronous>, transform_indices = @transform_2, window_bounds = array<i64: 1, 128>}, {pipeline_mode = #tpu.pipeline_mode<synchronous>, transform_indices = @transform_3, window_bounds = array<i64: 1, 128>}, {pipeline_mode = #tpu.pipeline_mode<synchronous>, transform_indices = @transform_4, window_bounds = array<i64: 1, 128>}, {pipeline_mode = #tpu.pipeline_mode<synchronous>, transform_indices = @transform_5, window_bounds = array<i64: 128, 128>}, {pipeline_mode = #tpu.pipeline_mode<synchronous>, transform_indices = @transform_6, window_bounds = array<i64: 1, 128>}, {pipeline_mode = #tpu.pipeline_mode<synchronous>, transform_indices = @transform_7, window_bounds = array<i64: 128, 1>}, {pipeline_mode = #tpu.pipeline_mode<synchronous>, transform_indices = @transform_8, window_bounds = array<i64: 1, 1>}, {transform_indices = @transform_9, window_bounds = array<i64: 8, 1>}, {transform_indices = @transform_10, window_bounds = array<i64: 8, 32>}]} {
    %c0 = arith.constant 0 : index
    %c0_0 = arith.constant 0 : index
    %0 = vector.load %arg1[%c0, %c0_0] : memref<8x32xf32, #tpu.memory_space<vmem>>, vector<8x32xf32>
    %1 = arith.truncf %0 : vector<8x32xf32> to vector<8x32xbf16>
    %c0_1 = arith.constant 0 : index
    %c0_2 = arith.constant 0 : index
    %2 = vector.load %arg2[%c0_1, %c0_2] : memref<32x128xbf16, #tpu.memory_space<vmem>>, vector<32x128xbf16>
    %cst = arith.constant dense<0.000000e+00> : vector<8x128xf32>
    %3 = tpu.matmul %1, %2, %cst {dimension_numbers = #tpu.dot_dimension_numbers<[1], [0], [0], [1], [0, 0, 1, 1], [], []>} : vector<8x32xbf16>, vector<32x128xbf16>, vector<8x128xf32> -> vector<8x128xf32>
    %c0_3 = arith.constant 0 : index
    %c0_4 = arith.constant 0 : index
    %4 = vector.load %arg3[%c0_3, %c0_4] : memref<1x128xf32, #tpu.memory_space<vmem>>, vector<1x128xf32>
    %5 = vector.broadcast %4 : vector<1x128xf32> to vector<8x128xf32>
    %6 = arith.addf %3, %5 : vector<8x128xf32>
    %cst_5 = arith.constant dense<0.000000e+00> : vector<8xf32>
    %7 = vector.multi_reduction <add>, %6, %cst_5 [1] : vector<8x128xf32> to vector<8xf32>
    %8 = vector.shape_cast %7 : vector<8xf32> to vector<8x1xf32>
    %cst_6 = arith.constant 3.125000e-02 : f32
    %9 = vector.broadcast %cst_6 : f32 to vector<8x1xf32>
    %10 = arith.mulf %8, %9 : vector<8x1xf32>
    %11 = vector.broadcast %10 : vector<8x1xf32> to vector<8x128xf32>
    %12 = arith.subf %6, %11 : vector<8x128xf32>
    %13 = tpu.iota {dimensions = array<i32: 1>} : vector<1x128xi32>
    %c32_i32 = arith.constant 32 : i32
    %14 = vector.broadcast %c32_i32 : i32 to vector<1x128xi32>
    %15 = arith.cmpi slt, %13, %14 : vector<1x128xi32>
    %16 = arith.extui %15 : vector<1x128xi1> to vector<1x128xi32>
    %17 = arith.sitofp %16 : vector<1x128xi32> to vector<1x128xf32>
    %18 = vector.broadcast %17 : vector<1x128xf32> to vector<8x128xf32>
    %19 = arith.mulf %12, %18 : vector<8x128xf32>
    %20 = arith.mulf %19, %19 : vector<8x128xf32>
    %cst_7 = arith.constant dense<0.000000e+00> : vector<8xf32>
    %21 = vector.multi_reduction <add>, %20, %cst_7 [1] : vector<8x128xf32> to vector<8xf32>
    %22 = vector.shape_cast %21 : vector<8xf32> to vector<8x1xf32>
    %cst_8 = arith.constant 3.125000e-02 : f32
    %23 = vector.broadcast %cst_8 : f32 to vector<8x1xf32>
    %24 = arith.mulf %22, %23 : vector<8x1xf32>
    %cst_9 = arith.constant 9.99999974E-6 : f32
    %25 = vector.broadcast %cst_9 : f32 to vector<8x1xf32>
    %26 = arith.addf %24, %25 : vector<8x1xf32>
    %27 = math.rsqrt %26 : vector<8x1xf32>
    %28 = vector.broadcast %27 : vector<8x1xf32> to vector<8x128xf32>
    %29 = arith.mulf %19, %28 : vector<8x128xf32>
    %c0_10 = arith.constant 0 : index
    %c0_11 = arith.constant 0 : index
    %30 = vector.load %arg4[%c0_10, %c0_11] : memref<1x128xf32, #tpu.memory_space<vmem>>, vector<1x128xf32>
    %31 = vector.broadcast %30 : vector<1x128xf32> to vector<8x128xf32>
    %32 = arith.mulf %29, %31 : vector<8x128xf32>
    %c0_12 = arith.constant 0 : index
    %c0_13 = arith.constant 0 : index
    %33 = vector.load %arg5[%c0_12, %c0_13] : memref<1x128xf32, #tpu.memory_space<vmem>>, vector<1x128xf32>
    %34 = vector.broadcast %33 : vector<1x128xf32> to vector<8x128xf32>
    %35 = arith.addf %32, %34 : vector<8x128xf32>
    %cst_14 = arith.constant 0.000000e+00 : f32
    %36 = vector.broadcast %cst_14 : f32 to vector<8x128xf32>
    %37 = arith.maximumf %35, %36 : vector<8x128xf32>
    %38 = arith.truncf %37 : vector<8x128xf32> to vector<8x128xbf16>
    %c0_15 = arith.constant 0 : index
    %c0_16 = arith.constant 0 : index
    %39 = vector.load %arg6[%c0_15, %c0_16] : memref<128x128xbf16, #tpu.memory_space<vmem>>, vector<128x128xbf16>
    %cst_17 = arith.constant dense<0.000000e+00> : vector<8x128xf32>
    %40 = tpu.matmul %38, %39, %cst_17 {dimension_numbers = #tpu.dot_dimension_numbers<[1], [0], [0], [1], [0, 0, 1, 1], [], []>} : vector<8x128xbf16>, vector<128x128xbf16>, vector<8x128xf32> -> vector<8x128xf32>
    %c0_18 = arith.constant 0 : index
    %c0_19 = arith.constant 0 : index
    %41 = vector.load %arg7[%c0_18, %c0_19] : memref<1x128xf32, #tpu.memory_space<vmem>>, vector<1x128xf32>
    %42 = vector.broadcast %41 : vector<1x128xf32> to vector<8x128xf32>
    %43 = arith.addf %40, %42 : vector<8x128xf32>
    %cst_20 = arith.constant 0.000000e+00 : f32
    %44 = vector.broadcast %cst_20 : f32 to vector<8x128xf32>
    %45 = arith.maximumf %43, %44 : vector<8x128xf32>
    %46 = arith.truncf %45 : vector<8x128xf32> to vector<8x128xbf16>
    %c0_21 = arith.constant 0 : index
    %c0_22 = arith.constant 0 : index
    %47 = vector.load %arg8[%c0_21, %c0_22] : memref<128x1xbf16, #tpu.memory_space<vmem>>, vector<128x1xbf16>
    %cst_23 = arith.constant dense<0.000000e+00> : vector<8x1xf32>
    %48 = tpu.matmul %46, %47, %cst_23 {dimension_numbers = #tpu.dot_dimension_numbers<[1], [0], [0], [1], [0, 0, 1, 1], [], []>} : vector<8x128xbf16>, vector<128x1xbf16>, vector<8x1xf32> -> vector<8x1xf32>
    %c0_24 = arith.constant 0 : index
    %c0_25 = arith.constant 0 : index
    %49 = vector.load %arg9[%c0_24, %c0_25] : memref<1x1xf32, #tpu.memory_space<vmem>>, vector<1x1xf32>
    %50 = vector.broadcast %49 : vector<1x1xf32> to vector<8x1xf32>
    %51 = arith.addf %48, %50 : vector<8x1xf32>
    %c0_26 = arith.constant 0 : index
    %c0_27 = arith.constant 0 : index
    %52 = vector.load %arg10[%c0_26, %c0_27] : memref<8x1xf32, #tpu.memory_space<vmem>>, vector<8x1xf32>
    tpu.vector_store %arg10[%c0_26, %c0_27], %51 {strides = array<i32>} : memref<8x1xf32, #tpu.memory_space<vmem>>, vector<8x1xf32>,
    %53 = vector.extract_strided_slice %45 {offsets = [0, 0], sizes = [8, 32], strides = [1, 1]} : vector<8x128xf32> to vector<8x32xf32>
    %54 = arith.truncf %53 : vector<8x32xf32> to vector<8x32xbf16>
    %c0_28 = arith.constant 0 : index
    %c0_29 = arith.constant 0 : index
    %55 = vector.load %arg11[%c0_28, %c0_29] : memref<8x32xbf16, #tpu.memory_space<vmem>>, vector<8x32xbf16>
    tpu.vector_store %arg11[%c0_28, %c0_29], %54 {strides = array<i32>} : memref<8x32xbf16, #tpu.memory_space<vmem>>, vector<8x32xbf16>,
    return
  }
  func.func @transform_0(%arg0: i32) -> (i32, i32) {
    %c0_i32 = arith.constant 0 : i32
    %c0_i32_0 = arith.constant 0 : i32
    return %arg0, %c0_i32 : i32, i32
  }
  func.func @transform_1(%arg0: i32) -> (i32, i32) {
    %c0_i32 = arith.constant 0 : i32
    %c0_i32_0 = arith.constant 0 : i32
    %c0_i32_1 = arith.constant 0 : i32
    return %c0_i32, %c0_i32_0 : i32, i32
  }
  func.func @transform_2(%arg0: i32) -> (i32, i32) {
    %c0_i32 = arith.constant 0 : i32
    %c0_i32_0 = arith.constant 0 : i32
    %c0_i32_1 = arith.constant 0 : i32
    return %c0_i32, %c0_i32_0 : i32, i32
  }
  func.func @transform_3(%arg0: i32) -> (i32, i32) {
    %c0_i32 = arith.constant 0 : i32
    %c0_i32_0 = arith.constant 0 : i32
    %c0_i32_1 = arith.constant 0 : i32
    return %c0_i32, %c0_i32_0 : i32, i32
  }
  func.func @transform_4(%arg0: i32) -> (i32, i32) {
    %c0_i32 = arith.constant 0 : i32
    %c0_i32_0 = arith.constant 0 : i32
    %c0_i32_1 = arith.constant 0 : i32
    return %c0_i32, %c0_i32_0 : i32, i32
  }
  func.func @transform_5(%arg0: i32) -> (i32, i32) {
    %c0_i32 = arith.constant 0 : i32
    %c0_i32_0 = arith.constant 0 : i32
    %c0_i32_1 = arith.constant 0 : i32
    return %c0_i32, %c0_i32_0 : i32, i32
  }
  func.func @transform_6(%arg0: i32) -> (i32, i32) {
    %c0_i32 = arith.constant 0 : i32
    %c0_i32_0 = arith.constant 0 : i32
    %c0_i32_1 = arith.constant 0 : i32
    return %c0_i32, %c0_i32_0 : i32, i32
  }
  func.func @transform_7(%arg0: i32) -> (i32, i32) {
    %c0_i32 = arith.constant 0 : i32
    %c0_i32_0 = arith.constant 0 : i32
    %c0_i32_1 = arith.constant 0 : i32
    return %c0_i32, %c0_i32_0 : i32, i32
  }
  func.func @transform_8(%arg0: i32) -> (i32, i32) {
    %c0_i32 = arith.constant 0 : i32
    %c0_i32_0 = arith.constant 0 : i32
    %c0_i32_1 = arith.constant 0 : i32
    return %c0_i32, %c0_i32_0 : i32, i32
  }
  func.func @transform_9(%arg0: i32) -> (i32, i32) {
    %c0_i32 = arith.constant 0 : i32
    %c0_i32_0 = arith.constant 0 : i32
    return %arg0, %c0_i32 : i32, i32
  }
  func.func @transform_10(%arg0: i32) -> (i32, i32) {
    %c0_i32 = arith.constant 0 : i32
    %c0_i32_0 = arith.constant 0 : i32
    return %arg0, %c0_i32 : i32, i32
  }
}

</mosaic_0001>

<bundles_post_ra>
// kernel: mlp_critic_forward.1
= control target key start
LH: loop header
LB: loop body
LE: loop exit
PB: predicated region body
PF: predicated region fallthrough
CT: control target
= control target key end

     0   :  { %s744_s0 = inlined_call_operand.vmem [shape: f32[8,32], index: 0, kind: input, shape index: {}]   ;;  %s745_s1 = inlined_call_operand.vmem [shape: bf16[32,128], index: 1, kind: input, shape index: {}]   ;;  %s746_s2 = inlined_call_operand.vmem [shape: f32[1,128], index: 2, kind: input, shape index: {}]   ;;  %s747_s3 = inlined_call_operand.vmem [shape: f32[1,128], index: 3, kind: input, shape index: {}]   ;;  %s748_s4 = inlined_call_operand.vmem [shape: f32[1,128], index: 4, kind: input, shape index: {}]   ;;  %s749_s5 = inlined_call_operand.vmem [shape: bf16[128,128], index: 5, kind: input, shape index: {}]   ;;  %s750_s6 = inlined_call_operand.hbm [shape: f32[1,128], index: 6, kind: input, shape index: {}]   ;;  %s751_s7 = inlined_call_operand.vmem [shape: bf16[128,1], index: 7, kind: input, shape index: {}]   ;;  %s752_s8 = inlined_call_operand.<no memory space> [shape: f32[1,1], index: 8, kind: input, shape index: {}]   ;;  %s753_s9 = inlined_call_operand.vmem [shape: f32[8,1], index: 9, kind: output, shape index: {0}]   ;;  %s754_s10 = inlined_call_operand.hbm [shape: bf16[8,32], index: 10, kind: output, shape index: {1}]  }
   0x1   :  { %v16_v0 = vstv %s752_s8 }
   0x2   :  { %17 = vst [vmem:[#allocation2] sm:$0x1] %v16_v0 }
   0x3   :  { %18 = vsyncpa [#allocation4], 0 }
   0x4   :  { %19 = vsyncpa [#allocation5], 0  ;;  %s567_s15 = smov [#allocation3]   ;;  %s519_s19 = scalar_lea.hbm %s750_s6, 16 }
   0x5   :  { %s38_s16 = sshll.u32 %s567_s15, 4  ;;  %p520_p0 = scmp.ne.s32.totalorder %s750_s6, %s519_s19  ;;  %s39_s16 = int_to_ptr.vmem [resolvable:$true] %s38_s16 }
   0x6   :  { %p523_p1 = scmp.lt.u32.totalorder %s519_s19, %s750_s6 }
   0x8   :  { %p525_p2 = pnand %p523_p1, %p520_p0 }
   0xa   :  { %528 = shalt.err (!%p525_p2)
}
   0xb   :  { %s529_s8 = scalar_lea.vmem %s39_s16, 16  ;;  %s533_s24 = scalar_lea.vmem %s39_s16, 32 }
   0xc   :  { %p530_p3 = scmp.ne.s32.totalorder %s39_s16, %s529_s8  ;;  %p534_p4 = scmp.lt.s32.totalorder %s39_s16, %s39_s16 }
   0xd   :  { %p535_p5 = scmp.lt.s32.totalorder %s533_s24, %s529_s8 }
   0xf   :  { %p536_p6 = por %p535_p5, %p534_p4 }
  0x11   :  { %p537_p7 = pnand %p536_p6, %p530_p3 }
  0x13   :  { %540 = shalt.err (!%p537_p7)
}
  0x14   :  { %41 = dma.hbm_to_vmem [thread:$0]  %s750_s6, 16, %s39_s16, [#allocation4]  }
  0x15   :  { %563 = dma.done.wait [#allocation4], 16  }
  0x16   :  { %564 = vsyncadd [#allocation4], 4294967280  ;;  %v568_v1 = vmov 0.0   ;;  %vm569_vm0 = vmmov 0   ;;  %v499_v2 = vld [vmem:[%s745_s1] sm:$0xff]   ;;  %v500_v3 = vld [vmem:[%s745_s1 + $0x8] sm:$0xff]   ;;  %v123_v14 = vlaneseq }
  0x17   :  { %447 = vmatprep.subr.bf16.mxu0 %v568_v1  ;;  %451 = vmatprep.mubr.msk.bf16.mxu0 %vm569_vm0, %v568_v1  ;;  %v50_v4 = vld [vmem:[%s744_s0] sm:$0xff]  ;;  %vm75_vm1 = vcmask 261120   ;;  %v502_v13 = vld [vmem:[%s749_s5 + $0x8] sm:$0xff]   ;;  %v503_v22 = vld [vmem:[%s749_s5 + $0x10] sm:$0xff]   ;;  %vm380_vm3 = vcmask 257024  }
  0x18   :  { %455 = vmatprep.subr.bf16.mxu1 %v568_v1  ;;  %471 = vmatprep.mubr.msk.bf16.mxu1 %vm569_vm0, %v568_v1  ;;  %v51_v5 = vpack.c.bf16 %v50_v4, %v50_v4  ;;  %v401_v6 = vld [vmem:[%s746_s2] ss:$0 sm:$0xff]  ;;  %v124_v15 = vand.u32 127, %v123_v14  ;;  %v504_v23 = vld [vmem:[%s749_s5 + $0x18] sm:$0xff]   ;;  %v506_v25 = vld [vmem:[%s749_s5 + $0x28] sm:$0xff]  }
  0x19   :  { %448 = vmatpush3.bf16.msra.mxu0 %v499_v2  ;;  %v501_v12 = vld [vmem:[%s749_s5] sm:$0xff]   ;;  %v507_v26 = vld [vmem:[%s749_s5 + $0x30] sm:$0xff]   ;;  %v508_v27 = vld [vmem:[%s749_s5 + $0x38] sm:$0xff]  }
  0x1a   :  { %449 = vmatprep.subr.bf16.mxu0 %v568_v1  ;;  %456 = vmatpush3.bf16.msra.mxu1 %v501_v12  ;;  %vm125_vm2 = vcmp.lt.s32.totalorder %v124_v15, 32  ;;  %v505_v24 = vld [vmem:[%s749_s5 + $0x20] sm:$0xff]   ;;  %v510_v29 = vld [vmem:[%s751_s7 + $0x8] sm:$0xff]   ;;  %v511_v30 = vld [vmem:[%s751_s7 + $0x10] sm:$0xff]  }
  0x1b   :  { %457 = vmatprep.subr.bf16.mxu1 %v568_v1  ;;  %v405_v18 = vsel %vm125_vm2, 1.0, %v568_v1  ;;  %v509_v28 = vld [vmem:[%s751_s7] sm:$0xff]   ;;  %v512_v31 = vld [vmem:[%s751_s7 + $0x18] sm:$0xff]   ;;  %v514_v33 = vld [vmem:[%s751_s7 + $0x28] sm:$0xff]  }
  0x1c   :  { %v513_v32 = vld [vmem:[%s751_s7 + $0x20] sm:$0xff]   ;;  %v515_v45 = vld [vmem:[%s751_s7 + $0x30] sm:$0xff]   ;;  %v516_v46 = vld [vmem:[%s751_s7 + $0x38] sm:$0xff]  }
  0x1d   :  { %450 = vmatpush3.bf16.msra.mxu0 %v500_v3  ;;  %v406_v38 = vld [vmem:[%s747_s3] ss:$0 sm:$0xff]  ;;  %v408_v47 = vld [vmem:[#allocation3] ss:$0 sm:$0xff]  ;;  %s570_s3 = smov [#allocation6]  }
  0x1e   :  { %475 = vmatprep.subr.bf16.mxu0 %v568_v1  ;;  %458 = vmatpush3.bf16.msra.mxu1 %v502_v13  ;;  %v407_v40 = vld [vmem:[%s748_s4] ss:$0 sm:$0xff]  ;;  %s390_s4 = sshll.u32 %s570_s3, 4  ;;  %s391_s4 = int_to_ptr.vmem [resolvable:$true] %s390_s4 }
  0x1f   :  { %459 = vmatprep.subr.bf16.mxu1 %v568_v1  ;;  %s541_s21 = scalar_lea.vmem %s391_s4, 64  ;;  %p546_p9 = scmp.lt.s32.totalorder %s391_s4, %s391_s4 }
  0x20   :  { %452 = vmatmul.mubr.msk.bf16.vlgmr.msra.gmra.mrb[0].mxu0 %vm75_vm1, %v51_v5  ;;  %p542_p8 = scmp.ne.s32.totalorder %s391_s4, %s541_s21  ;;  %p547_p10 = scmp.lt.s32.totalorder %s541_s21, %s541_s21 }
  0x21   :  { %491 = vmatprep.mubr.msk.bf16.mxu0 %vm569_vm0, %v568_v1  ;;  %476 = vmatpush3.bf16.msra.mxu0 %v509_v28 }
  0x22   :  { %460 = vmatpush3.bf16.msra.mxu1 %v503_v22  ;;  %477 = vmatprep.subr.bf16.mxu0 %v568_v1  ;;  %p548_p11 = por %p547_p10, %p546_p9 }
  0x23   :  { %461 = vmatprep.subr.bf16.mxu1 %v568_v1 }
  0x24   :  { %p549_p12 = pnand %p548_p11, %p542_p8 }
  0x25   :  { %478 = vmatpush3.bf16.msra.mxu0 %v510_v29 }
  0x26   :  { %462 = vmatpush3.bf16.msra.mxu1 %v504_v23  ;;  %479 = vmatprep.subr.bf16.mxu0 %v568_v1 }
  0x27   :  { %463 = vmatprep.subr.bf16.mxu1 %v568_v1 }
  0x29   :  { %480 = vmatpush3.bf16.msra.mxu0 %v511_v30 }
  0x2a   :  { %464 = vmatpush3.bf16.msra.mxu1 %v505_v24  ;;  %481 = vmatprep.subr.bf16.mxu0 %v568_v1 }
  0x2b   :  { %465 = vmatprep.subr.bf16.mxu1 %v568_v1 }
  0x2d   :  { %482 = vmatpush3.bf16.msra.mxu0 %v512_v31 }
  0x2e   :  { %466 = vmatpush3.bf16.msra.mxu1 %v506_v25  ;;  %483 = vmatprep.subr.bf16.mxu0 %v568_v1 }
  0x2f   :  { %467 = vmatprep.subr.bf16.mxu1 %v568_v1 }
  0x31   :  { %484 = vmatpush3.bf16.msra.mxu0 %v513_v32 }
  0x32   :  { %468 = vmatpush3.bf16.msra.mxu1 %v507_v26  ;;  %485 = vmatprep.subr.bf16.mxu0 %v568_v1 }
  0x33   :  { %469 = vmatprep.subr.bf16.mxu1 %v568_v1 }
  0x35   :  { %486 = vmatpush3.bf16.msra.mxu0 %v514_v33 }
  0x36   :  { %470 = vmatpush3.bf16.msra.mxu1 %v508_v27  ;;  %487 = vmatprep.subr.bf16.mxu0 %v568_v1 }
  0x39   :  { %488 = vmatpush3.bf16.msra.mxu0 %v515_v45 }
  0x3a   :  { %489 = vmatprep.subr.bf16.mxu0 %v568_v1 }
  0x3d   :  { %490 = vmatpush3.bf16.msra.mxu0 %v516_v46 }
  0xf3   :  { %v113_v7 = vpop.f32.mrb[0].mxu0 }
  0xf4   :  { %v114_v8 = vadd.f32 %v401_v6, %v113_v7  ;;  %v453_v9 = vpop.f32.mrb[1].mxu0 }
  0xf5   :  { %v116_v10 = vpop.f32.mrb[2].mxu0 }
  0xf6   :  { %119 = vadd.xlane.f32.xlu0 %v114_v8  ;;  %v454_v11 = vpop.f32.mrb[3].mxu0 }
 0x183   :  { %v120_v16 = vpop.xlane.xlu0 %119 }
 0x184   :  { %v121_v17 = vmul.f32 0.03125, %v120_v16 }
 0x186   :  { %v122_v19 = vsub.f32 %v114_v8, %v121_v17 }
 0x188   :  { %v128_v20 = vmul.f32 %v405_v18, %v122_v19 }
 0x18a   :  { %v129_v21 = vmul.f32 %v128_v20, %v128_v20 }
 0x18c   :  { %130 = vadd.xlane.f32.xlu0 %v129_v21 }
 0x219   :  { %v131_v34 = vpop.xlane.xlu0 %130 }
 0x21a   :  { %v132_v35 = vmul.f32 0.03125, %v131_v34 }
 0x21c   :  { %v133_v36 = vadd.f32 1e-05, %v132_v35 }
 0x21e   :  { %517 = vrsqrt.f32 %v133_v36 }
 0x228   :  { %v518_v37 = vpop.eup %517 }
 0x229   :  { %v135_v39 = vmul.f32 %v518_v37, %v128_v20 }
 0x22b   :  { %v143_v41 = vmul.f32 %v406_v38, %v135_v39 }
 0x22d   :  { %v151_v42 = vadd.f32 %v407_v40, %v143_v41 }
 0x22f   :  { %v152_v43 = vmax.f32 %v151_v42, 0.0 }
 0x231   :  { %v153_v44 = vpack.c.bf16 %v152_v43, %v152_v43 }
 0x233   :  { %472 = vmatmul.mubr.bf16.vlgmr.msra.gmra.mrb[0].mxu1 %v153_v44 }
 0x306   :  { %v259_v48 = vpop.f32.mrb[0].mxu1 }
 0x307   :  { %v260_v49 = vadd.f32 %v408_v47, %v259_v48  ;;  %v473_v50 = vpop.f32.mrb[1].mxu1 }
 0x308   :  { %v262_v51 = vpop.f32.mrb[2].mxu1 }
 0x309   :  { %v265_v52 = vmax.f32 %v260_v49, 0.0  ;;  %v474_v53 = vpop.f32.mrb[3].mxu1 }
 0x30b   :  { %v266_v54 = vpack.c.bf16 %v265_v52, %v265_v52 }
 0x30d   :  { %492 = vmatmul.mubr.bf16.vlgmr.msra.gmra.mrb[4].mxu0 %v266_v54  ;;  %381 = vst.msk [vmem:[#allocation6] sm:$0xf] %vm380_vm3, %v266_v54 }
 0x30e   :  { %552 = shalt.err (!%p549_p12)
}
 0x30f   :  { %s553_s23 = scalar_lea.hbm %s754_s10, 64 }
 0x310   :  { %p554_p13 = scmp.ne.s32.totalorder %s754_s10, %s553_s23  ;;  %p557_p0 = scmp.lt.u32.totalorder %s553_s23, %s754_s10 }
 0x312   :  { %p559_p1 = pnand %p557_p0, %p554_p13 }
 0x314   :  { %562 = shalt.err (!%p559_p1)
}
 0x315   :  { %393 = dma.vmem_to_hbm [thread:$0]  %s391_s4, 64, %s754_s10, [#allocation5]   ;;  %v417_v55 = vld [vmem:[#allocation2] ss:$0 sm:$0xff]  ;;  %vm378_vm4 = vcmask 7168  }
 0x3e0   :  { %v372_v56 = vpop.f32.mrb[4].mxu0 }
 0x3e1   :  { %v373_v57 = vadd.f32 %v417_v55, %v372_v56  ;;  %v493_v58 = vpop.f32.mrb[5].mxu0 }
 0x3e2   :  { %v375_v59 = vpop.f32.mrb[6].mxu0 }
 0x3e3   :  { %379 = vst.msk [vmem:[%s753_s9] sm:$0xff] %vm378_vm4, %v373_v57  ;;  %v494_v60 = vpop.f32.mrb[7].mxu0 }
 0x3e4   :  { %565 = dma.done.wait [#allocation5], 64  }
 0x3e5   :  { %566 = vsyncadd [#allocation5], 4294967232 }
 0x3e6   :  { %399 = vsyncpa [#allocation4], 1 }
 0x3e7   :  { %400 = vsyncpa [#allocation5], 1 }

</bundles_post_ra>
